<compile_context>
chip_gen: v7x
topology: tpu7x:2x2x1
jax: 0.10.0
libtpu: 0.0.40
codegen_flags: <defaults>
</compile_context>

<pallas_src>
import math

import jax
import jax.numpy as jnp
from jax.experimental import pallas as pl
from jax.experimental.pallas import tpu as pltpu

LOG_EPSILON = math.log(1e-10)


def _round_up(x, m):
    return (x + m - 1) // m * m


def _sublane(dtype):
    # sublane granularity: 8 rows of 32-bit; sub-32-bit dtypes pack along sublanes
    return 8 * (4 // jnp.dtype(dtype).itemsize)


def _subsample_kernel(x_ref, w_ref, b_ref, o_ref):
    # x_ref : (K_pad, tile_t)   window columns (8 taps x in_ch in sublanes, time in lanes)
    # w_ref : (N_pad, K_pad)    fused (1x1 conv ∘ depthwise k=8 s=4) weight, same dtype as x
    # b_ref : (N_pad, 1)        depthwise-conv bias, f32
    # o_ref : (N_pad, tile_t)   output block, already channel-major (NCW) layout
    z = jnp.dot(w_ref[...], x_ref[...], preferred_element_type=jnp.float32)
    o_ref[...] = (z + b_ref[...]).astype(o_ref.dtype)


def conv1d_subsampling_linear(x, x_len, w1, w2, bias, *, tile_t=512,
                              compute_dtype=jnp.bfloat16, out_dtype=None):
    """x: (B, in_ch, T) float32 (PyTorch NCW).  w1: (out_ch, in_ch, 1), w2: (out_ch, 1, 8),
    bias: (out_ch,).  Returns ((B, out_ch, T_out) in out_dtype (default x.dtype),
    floor(x_len / 4))."""
    B, in_ch, T = x.shape
    out_ch = w1.shape[0]
    out_dtype = x.dtype if out_dtype is None else jnp.dtype(out_dtype)

    t_out = (T + 4 - 8) // 4 + 1        # output length of k=8, stride=4 conv on padded input
    if t_out <= 0:
        raise ValueError(f"sequence too short for 4x subsampling: T={T}")

    # ---- pad time by 2 with LOG_EPSILON; build channel-major window columns ----------------
    # row r = j * in_ch + i holds x_pad[b, i, 4*m + j] at time column m (no full-tensor
    # transpose / concat passes over HBM — just 8 strided slices stacked on a tap axis).
    x_pad = jnp.pad(x, ((0, 0), (0, 0), (2, 2)), constant_values=LOG_EPSILON)
    taps = [x_pad[:, :, j:j + 4 * t_out:4] for j in range(8)]        # 8 x (B, in_ch, t_out)
    x_win = jnp.stack(taps, axis=1).reshape(B, 8 * in_ch, t_out)     # (B, 8*in_ch, t_out)
    # NOTE: for long-sequence serving the 8-tap block could be assembled inside the kernel
    # from NCW x in HBM (memory_space=pl.ANY + manual DMA) to avoid materializing x_win;
    # skipped here — the stacked form above is already transpose-free.

    # ---- pad to sublane/lane friendly sizes, cast streaming operands to compute_dtype ------
    K = 8 * in_ch
    K_pad = _round_up(K, _sublane(compute_dtype))     # sublane dim of the x block
    N_pad = _round_up(out_ch, _sublane(out_dtype))    # sublane dim of the output block

    tile_t = _round_up(max(tile_t, 128), 128)         # lane dim: keep it a multiple of 128
    t_out_r = _round_up(t_out, 128)
    tile_t = min(tile_t, t_out_r)
    if B == 1 and tile_t == t_out_r and t_out_r >= 256:
        # v7x megacore: guarantee >= 2 grid cells so both TensorCores get work
        tile_t = _round_up(t_out_r // 2, 128)
    t_out_pad = _round_up(t_out, tile_t)
    n_t = t_out_pad // tile_t

    x_win = jnp.pad(x_win, ((0, 0), (0, K_pad - K), (0, t_out_pad - t_out)))
    x_win = x_win.astype(compute_dtype)

    # fused weight:  wf[c, j*in_ch + i] = W2[c, 0, j] * W1[c, i, 0]   (matches x_win row order)
    wf = (w2[:, 0, :, None] * w1[:, None, :, 0]).reshape(out_ch, K)
    wf = jnp.pad(wf, ((0, N_pad - out_ch), (0, K_pad - K))).astype(compute_dtype)
    b2 = jnp.pad(bias, (0, N_pad - out_ch)).reshape(N_pad, 1).astype(jnp.float32)

    # double-buffered x / out tiles + (tiny, grid-invariant) weight & bias + scratch headroom
    c_sz = jnp.dtype(compute_dtype).itemsize
    o_sz = jnp.dtype(out_dtype).itemsize
    vmem_bytes = int(2 * (tile_t * K_pad * c_sz          # x tile
                          + N_pad * K_pad * c_sz         # fused weight
                          + N_pad * 4                    # bias (f32)
                          + N_pad * tile_t * o_sz)       # output tile
                     + (8 << 20))                        # internal scratch headroom
    assert vmem_bytes <= (48 << 20), (
        f"tile_t={tile_t}: working set {vmem_bytes >> 20} MiB too large for v7x VMEM")

    out_pad = pl.pallas_call(
        _subsample_kernel,
        out_shape=jax.ShapeDtypeStruct((B, N_pad, t_out_pad), out_dtype),
        grid_spec=pltpu.PrefetchScalarGridSpec(
            num_scalar_prefetch=0,
            grid=(B, n_t),
            in_specs=[
                pl.BlockSpec((pl.Squeezed(), K_pad, tile_t), lambda b, t: (b, 0, t)),
                # constant index maps -> weight / bias are fetched once and stay resident
                pl.BlockSpec((N_pad, K_pad), lambda b, t: (0, 0)),
                pl.BlockSpec((N_pad, 1), lambda b, t: (0, 0)),
            ],
            out_specs=pl.BlockSpec((pl.Squeezed(), N_pad, tile_t), lambda b, t: (b, 0, t)),
        ),
        compiler_params=pltpu.CompilerParams(
            dimension_semantics=("parallel", "parallel"),
            vmem_limit_bytes=vmem_bytes,
        ),
    )(x_win, wf, b2)

    # strip channel/time padding; output is already PyTorch NCW (B, out_ch, T_out)
    out_ncw = out_pad[:, :out_ch, :t_out]
    # matches torch.floor(x_len / 4) (float result, as in the module)
    x_len_out = jnp.floor(x_len / 4)
    return out_ncw, x_len_out


def _reference(x, x_len, w1, w2, bias):
    """Pure-JAX reference mirroring the PyTorch forward exactly (full-precision convs)."""
    x_pad = jnp.pad(x, ((0, 0), (0, 0), (2, 2)), constant_values=LOG_EPSILON)
    dn = ("NCH", "OIH", "NCH")
    hp = jax.lax.Precision.HIGHEST
    y = jax.lax.conv_general_dilated(x_pad, w1, window_strides=(1,), padding="VALID",
                                     dimension_numbers=dn, precision=hp)
    z = jax.lax.conv_general_dilated(y, w2, window_strides=(4,), padding="VALID",
                                     dimension_numbers=dn, feature_group_count=w2.shape[0],
                                     precision=hp)
    z = z + bias[None, :, None]
    return z, jnp.floor(x_len / 4)


if __name__ == "__main__":
    B, in_ch, out_ch, T = 2, 8, 32, 16

    key = jax.random.PRNGKey(0)
    kx, kw1, kw2, kb = jax.random.split(key, 4)
    x = jax.random.normal(kx, (B, in_ch, T), dtype=jnp.float32)
    x_len = jnp.array([16.0, 12.0], dtype=jnp.float32)

    # Conv1d(in_ch, out_ch, 1, bias=False) and depthwise Conv1d(out_ch, out_ch, 8, stride=4,
    # groups=out_ch) with bias
    w1 = 0.1 * jax.random.normal(kw1, (out_ch, in_ch, 1), dtype=jnp.float32)
    w2 = 0.1 * jax.random.normal(kw2, (out_ch, 1, 8), dtype=jnp.float32)
    bias = 0.1 * jax.random.normal(kb, (out_ch,), dtype=jnp.float32)

    ref, ref_len = _reference(x, x_len, w1, w2, bias)

    # f32 streaming path: tight check against the two-conv reference
    out_f32, out_len = conv1d_subsampling_linear(x, x_len, w1, w2, bias,
                                                 compute_dtype=jnp.float32)
    out_f32 = jax.block_until_ready(out_f32)
    out_len = jax.block_until_ready(out_len)
    assert out_f32.shape == ref.shape, (out_f32.shape, ref.shape)
    assert jnp.allclose(out_f32, ref, atol=1e-3, rtol=1e-3), \
        float(jnp.max(jnp.abs(out_f32 - ref)))
    assert jnp.allclose(out_len, ref_len)

    # bf16 streaming path (production configuration): relaxed tolerance for bf16 operands,
    # accumulation is still f32 on the MXU.
    out_bf16, out_len_b = conv1d_subsampling_linear(x, x_len, w1, w2, bias,
                                                    compute_dtype=jnp.bfloat16)
    out_bf16 = jax.block_until_ready(out_bf16)
    out_len_b = jax.block_until_ready(out_len_b)
    assert out_bf16.shape == ref.shape, (out_bf16.shape, ref.shape)
    assert jnp.allclose(out_bf16, ref, atol=5e-2, rtol=5e-2), \
        float(jnp.max(jnp.abs(out_bf16 - ref)))
    assert jnp.allclose(out_len_b, ref_len)

    print("KERNEL_OK")
</pallas_src>

<mosaic_0001>
module attributes {stable_mosaic.version = 11 : i64} {
  func.func @_subsample_kernel(%arg0: i32, %arg1: i32, %arg2: memref<1x64x128xf32, #tpu.memory_space<vmem>>, %arg3: memref<32x64xf32, #tpu.memory_space<vmem>>, %arg4: memref<32x1xf32, #tpu.memory_space<vmem>>, %arg5: memref<1x32x128xf32, #tpu.memory_space<vmem>>) attributes {dimension_semantics = [#tpu.dimension_semantics<parallel>, #tpu.dimension_semantics<parallel>], iteration_bounds = array<i64: 2, 1>, scalar_prefetch = 0 : i64, scratch_operands = 0 : i64, tpu.core_type = #tpu.core_type<tc>, window_params = [{transform_indices = @transform_0, window_bounds = array<i64: 1, 64, 128>}, {pipeline_mode = #tpu.pipeline_mode<synchronous>, transform_indices = @transform_1, window_bounds = array<i64: 32, 64>}, {pipeline_mode = #tpu.pipeline_mode<synchronous>, transform_indices = @transform_2, window_bounds = array<i64: 32, 1>}, {transform_indices = @transform_3, window_bounds = array<i64: 1, 32, 128>}]} {
    %c0 = arith.constant 0 : index
    %c0_0 = arith.constant 0 : index
    %0 = vector.load %arg3[%c0, %c0_0] : memref<32x64xf32, #tpu.memory_space<vmem>>, vector<32x64xf32>
    %c0_1 = arith.constant 0 : index
    %c0_2 = arith.constant 0 : index
    %c0_3 = arith.constant 0 : index
    %1 = vector.load %arg2[%c0_1, %c0_2, %c0_3] : memref<1x64x128xf32, #tpu.memory_space<vmem>>, vector<1x64x128xf32>
    %2 = vector.shape_cast %1 : vector<1x64x128xf32> to vector<64x128xf32>
    %cst = arith.constant dense<0.000000e+00> : vector<32x128xf32>
    %3 = tpu.matmul %0, %2, %cst {dimension_numbers = #tpu.dot_dimension_numbers<[1], [0], [0], [1], [0, 0, 1, 1], [], []>} : vector<32x64xf32>, vector<64x128xf32>, vector<32x128xf32> -> vector<32x128xf32>
    %c0_4 = arith.constant 0 : index
    %c0_5 = arith.constant 0 : index
    %4 = vector.load %arg4[%c0_4, %c0_5] : memref<32x1xf32, #tpu.memory_space<vmem>>, vector<32x1xf32>
    %5 = vector.broadcast %4 : vector<32x1xf32> to vector<32x128xf32>
    %6 = arith.addf %3, %5 : vector<32x128xf32>
    %c0_6 = arith.constant 0 : index
    %c0_7 = arith.constant 0 : index
    %c0_8 = arith.constant 0 : index
    %7 = vector.load %arg5[%c0_6, %c0_7, %c0_8] : memref<1x32x128xf32, #tpu.memory_space<vmem>>, vector<1x32x128xf32>
    %8 = vector.shape_cast %7 : vector<1x32x128xf32> to vector<32x128xf32>
    %9 = vector.shape_cast %6 : vector<32x128xf32> to vector<1x32x128xf32>
    tpu.vector_store %arg5[%c0_6, %c0_7, %c0_8], %9 {strides = array<i32>} : memref<1x32x128xf32, #tpu.memory_space<vmem>>, vector<1x32x128xf32>,
    return
  }
  func.func @transform_0(%arg0: i32, %arg1: i32) -> (i32, i32, i32) {
    %c0_i32 = arith.constant 0 : i32
    %c0_i32_0 = arith.constant 0 : i32
    return %arg0, %c0_i32, %arg1 : i32, i32, i32
  }
  func.func @transform_1(%arg0: i32, %arg1: i32) -> (i32, i32) {
    %c0_i32 = arith.constant 0 : i32
    %c0_i32_0 = arith.constant 0 : i32
    %c0_i32_1 = arith.constant 0 : i32
    return %c0_i32, %c0_i32_0 : i32, i32
  }
  func.func @transform_2(%arg0: i32, %arg1: i32) -> (i32, i32) {
    %c0_i32 = arith.constant 0 : i32
    %c0_i32_0 = arith.constant 0 : i32
    %c0_i32_1 = arith.constant 0 : i32
    return %c0_i32, %c0_i32_0 : i32, i32
  }
  func.func @transform_3(%arg0: i32, %arg1: i32) -> (i32, i32, i32) {
    %c0_i32 = arith.constant 0 : i32
    %c0_i32_0 = arith.constant 0 : i32
    return %arg0, %c0_i32, %arg1 : i32, i32, i32
  }
}

</mosaic_0001>

<bundles_post_ra>
// kernel: tpu_custom_call.1
= control target key start
LH: loop header
LB: loop body
LE: loop exit
PB: predicated region body
PF: predicated region fallthrough
CT: control target
= control target key end

     0   :  { %8 = vsyncpa [#allocation3], 0  ;;  %s937_s0 = inlined_call_operand.hbm [shape: f32[2,64,128], index: 0, kind: input, shape index: {}]   ;;  %s938_s1 = inlined_call_operand.vmem [shape: f32[32,64], index: 1, kind: input, shape index: {}]   ;;  %s939_s2 = inlined_call_operand.vmem [shape: f32[32,1], index: 2, kind: input, shape index: {}]   ;;  %s940_s3 = inlined_call_operand.hbm [shape: f32[2,32,128], index: 3, kind: output, shape index: {}]  }
   0x1   :  { %10 = vsyncpa [#allocation3 + $0x1], 0 }
   0x2   :  { %11 = vsyncpa [#allocation4], 0 }
   0x3   :  { %13 = vsyncpa [#allocation4 + $0x1], 0  ;;  %s733_s12 = smov 0   ;;  %s735_s13 = smov 0  }
   0x4   :  { %s737_s14 = smov 0   ;;  %s739_s15 = smov 0  }
   0x5   :  { %s741_s16 = smov 0   ;;  %s743_s17 = smov 0  }
   0x6 LB: > { %s444_s18 = sadd.s32 4294967295, %s704_s17   ;;  %s445_s19 = sadd.s32 4294967294, %s704_s17   ;;  %s704_s17 = sphi %s743_s17, %s19_s17   ;;  %s700_s16 = sphi %s741_s16, %s955_s16   ;;  %s696_s15 = sphi %s739_s15, %s954_s15   ;;  %s692_s14 = sphi %s737_s14, %s953_s14   ;;  %s688_s13 = sphi %s735_s13, %s952_s13   ;;  %s684_s12 = sphi %s733_s12, %s951_s12  }
   0x7   : > { %s31_s20 = sadd.s32 1, %s700_s16  ;;  %s40_s21 = sadd.s32 1, %s692_s14 }
   0x8   : > { %p33_p0 = scmp.ge.s32.totalorder %s31_s20, 2  ;;  %p47_p1 = scmp.ne.s32.totalorder %s692_s14, %s688_s13 }
   0x9   : > { %p48_p2 = scmp.eq.s32.totalorder %s704_s17, 0  ;;  %p53_p3 = scmp.ne.s32.totalorder %s688_s13, %s684_s12 }
   0xa   : > { %s957_s20 = smov (%p33_p0, %s31_s20), 0  ;;  %p54_p5 = scmp.eq.s32.totalorder %s444_s18, 0 }
   0xb   : > { %p774_p4 = por %p48_p2, %p47_p1  ;;  %s35_s23 = ssub.s32 %s700_s16, %s957_s20 }
   0xc   : > { %p121_p6 = scmp.eq.s32.totalorder %s444_s18, 1  ;;  %p38_p7 = scmp.eq.s32.totalorder %s35_s23, 0 }
   0xd   : > { %p780_p8 = por %p54_p5, %p53_p3  ;;  %p127_p10 = scmp.eq.s32.totalorder %s445_s19, 1 }
   0xe   : > { %p784_p9 = por %p121_p6, %p47_p1  ;;  %p535_p13 = scmp.lt.s32.totalorder %s704_s17, 2 }
   0xf   : > { %s789_s26 = scalar_select %p38_p7, %s692_s14, %s40_s21  }
  0x10   : > { %s944_s25 = scalar_select %p784_p9, 1, 0 }
  0x11   : > { %p791_p11 = por %p127_p10, %p53_p3  ;;  %s153_s28 = sand.u32 1, %s692_s14  }
  0x12   : > { %s448_s29 = sshll.u32 %s153_s28, 6  ;;  %s463_s30 = sshll.u32 %s700_s16, 10 }
  0x13   : > { %s945_s27 = scalar_select %p791_p11, 1, 0 }
  0x14   : > { %s802_s6 = scalar_lea.hbm %s937_s0, %s463_s30  ;;  %s157_s7 = scalar_lea.vmem [#allocation2], %s448_s29 }
  0x15   : > { %s165_s8 = sshll.u32 %s157_s7, 4  ;;  %p808_p0 = pnand %p535_p13, %p774_p4  ;;  %s804_s8 = int_to_ptr.vmem [resolvable:$true] %s165_s8 }
  0x16   : > { %s813_s10 = scalar_lea.sflag [#allocation3], %s153_s28  ;;  %s592_s11 = scalar_lea.hbm %s802_s6, 1024 }
  0x17   : > { %p593_p2 = scmp.ne.s32.totalorder %s802_s6, %s592_s11  ;;  %p594_p3 = pneg %p808_p0 }
  0x18   : > { %s597_s21 = scalar_lea.hbm %s937_s0, 2048  ;;  %p598_p4 = scmp.lt.u32.totalorder %s802_s6, %s937_s0 }
  0x19   : > { %p595_p5 = pnand %p594_p3, %p593_p2  ;;  %p599_p7 = scmp.lt.u32.totalorder %s597_s21, %s592_s11 }
  0x1a   : > { %p601_p13 = scmp.lt.u32.totalorder %s592_s11, %s802_s6 }
  0x1b   : > { %p596_p6 = pneg %p595_p5  ;;  %p600_p10 = por %p599_p7, %p598_p4 }
  0x1d   : > { %p602_p12 = por %p601_p13, %p600_p10 }
  0x1f   : > { %p603_p1 = pnand %p602_p12, %p596_p6 }
  0x21   : > { %606 = shalt.err (!%p603_p1)
}
  0x22   : > { %s607_s28 = scalar_lea.vmem %s804_s8, 1024  ;;  %s706_s29 = smov [#allocation2]  }
  0x23   : > { %p608_p2 = scmp.ne.s32.totalorder %s804_s8, %s607_s28  ;;  %s612_s30 = sshll.u32 %s706_s29, 4  ;;  %s613_s30 = int_to_ptr.vmem [resolvable:$false] %s612_s30 }
  0x24   : > { %s614_s4 = scalar_lea.vmem %s613_s30, 2048  ;;  %p615_p9 = scmp.lt.s32.totalorder %s804_s8, %s613_s30 }
  0x25   : > { %p610_p5 = pnand %p608_p2, %p594_p3  ;;  %p616_p4 = scmp.lt.s32.totalorder %s614_s4, %s607_s28 }
  0x27   : > { %p611_p11 = pneg %p610_p5  ;;  %p617_p7 = por %p616_p4, %p615_p9 }
  0x29   : > { %p618_p10 = pnand %p617_p7, %p611_p11 }
  0x2b   : > { %621 = shalt.err (!%p618_p10)
}
  0x2c   : > { %s707_s5 = smov 128   ;;  %s708_s7 = smov 8  }
  0x2d   : > { %530 = dma.hbm_to_vmem [thread:$0]  (!%p808_p0), %s802_s6, 1024, %s804_s8, %s813_s10, %s707_s5, %s707_s5, %s708_s7  }
  0x2e   : > { %p173_p12 = scmp.lt.s32.totalorder %s704_s17, 3  ;;  %p947_p1 = scmp.ge.s32.totalorder %s704_s17, 1 }
  0x30   : > { %p174_p3 = pnand %p947_p1, %p173_p12 }
  0x31   : > { %s845_s11 = sand.u32 (!%p174_p3), 1, %s688_s13  }
  0x32   : > { %177 = sbr.rel (%p174_p3) target bundleno = 307 (0x133), region = 32  ;;  %s452_s18 = sshll.u32 (!%p174_p3), %s845_s11, 6 }
  0x33   : > { %s180_s19 = scalar_lea.sflag (!%p174_p3), [#allocation3], %s845_s11  ;;  %s183_s21 = scalar_lea.vmem (!%p174_p3), [#allocation2], %s452_s18 }
  0x39   : > { %675 = dma.done.wait (%p780_p8), %s180_s19, 1024  }
  0x3a   : > { %677 = vsyncadd (%p780_p8), %s180_s19, 4294966272  ;;  %v709_v0 = vmov 0   ;;  %v210_v1 = vld [vmem:[%s183_s21] sm:$0xff]  ;;  %v211_v2 = vld [vmem:[%s183_s21 + $0x8] sm:$0xff]  ;;  %vm242_vm0 = vcmask 523264   ;;  %s453_s6 = sshll.u32 %s845_s11, 5 }
  0x3b   : > { %591 = vset.pattern.permute.xlu1 %v709_v0  ;;  %590 = vset.pattern.permute.xlu0 %v709_v0  ;;  %v212_v3 = vld [vmem:[%s183_s21 + $0x10] sm:$0xff]  ;;  %v499_v4 = vpack.c.bf16 %v211_v2, %v210_v1  ;;  %v213_v5 = vld [vmem:[%s183_s21 + $0x18] sm:$0xff]  ;;  %v214_v7 = vld [vmem:[%s183_s21 + $0x20] sm:$0xff]  ;;  %s205_s8 = scalar_lea.vmem [#allocation5], %s453_s6  ;;  %s464_s9 = sshll.u32 %s696_s15, 9 }
  0x3c   : > { %v503_v6 = vpack.c.bf16 %v213_v5, %v212_v3  ;;  %v215_v8 = vld [vmem:[%s183_s21 + $0x28] sm:$0xff]  ;;  %v206_v9 = vld [vmem:[%s938_s1] sm:$0xff]  ;;  %v208_v10 = vld [vmem:[%s938_s1 + $0x10] sm:$0xff]  ;;  %s359_s24 = sshll.u32 %s205_s8, 4  ;;  %s888_s23 = scalar_lea.hbm %s940_s3, %s464_s9  ;;  %s883_s24 = int_to_ptr.vmem [resolvable:$true] %s359_s24 }
  0x3d   : > { %500 = vmatprep.subr.bf16.mxu0 %v499_v4  ;;  %515 = vmatprep.subr.bf16.mxu1 %v499_v4  ;;  %v220_v11 = vld [vmem:[%s939_s2 + $0x10] sm:$0xff]  ;;  %v218_v12 = vld [vmem:[%s939_s2] sm:$0xff]  ;;  %v507_v13 = vpack.c.bf16 %v215_v8, %v214_v7  ;;  %v217_v15 = vld [vmem:[%s183_s21 + $0x38] sm:$0xff]  ;;  %s345_s15 = scalar_lea.sflag [#allocation4], %s845_s11  ;;  %s622_s28 = scalar_lea.vmem %s883_s24, 512 }
  0x3e   : > { %502 = vmatpush3.bf16.msra.mxu0 %v499_v4  ;;  %519 = vmatpush3.bf16.msra.mxu1 %v499_v4  ;;  %v216_v14 = vld [vmem:[%s183_s21 + $0x30] sm:$0xff]  ;;  %v221_v16 = vld [vmem:[%s939_s2 + $0x18] sm:$0xff]  ;;  %v219_v17 = vld [vmem:[%s939_s2 + $0x8] sm:$0xff]  ;;  %p623_p8 = scmp.ne.s32.totalorder %s883_s24, %s622_s28  ;;  %p948_p9 = scmp.ne.s32.totalorder %s944_s25, 0 }
  0x3f   : > { %504 = vmatprep.subr.bf16.mxu0 %v503_v6  ;;  %516 = vmatprep.subr.bf16.mxu1 %v503_v6  ;;  %v511_v18 = vpack.c.bf16 %v217_v15, %v216_v14  ;;  %v207_v19 = vld [vmem:[%s938_s1 + $0x8] sm:$0xff]  ;;  %v209_v20 = vld [vmem:[%s938_s1 + $0x18] sm:$0xff]  ;;  %s710_s29 = smov [#allocation5]  }
  0x40   : > { %493 = vmatprep.mubr.msk.f32.mxu0 %vm242_vm0, %v206_v9  ;;  %496 = vmatprep.mubr.msk.f32.mxu1 %vm242_vm0, %v208_v10  ;;  %p624_p11 = pnand %p623_p8, %p948_p9  ;;  %s626_s30 = sshll.u32 %s710_s29, 4  ;;  %s627_s30 = int_to_ptr.vmem [resolvable:$false] %s626_s30 }
  0x41   : > { %234 = vperm.xlu1 %591, %v220_v11   ;;  %224 = vperm.xlu0 %590, %v218_v12   ;;  %s628_s4 = scalar_lea.vmem %s627_s30, 1024  ;;  %p629_p6 = scmp.lt.s32.totalorder %s883_s24, %s627_s30 }
  0x42   : > { %506 = vmatpush3.bf16.msra.mxu0 %v503_v6  ;;  %520 = vmatpush3.bf16.msra.mxu1 %v503_v6  ;;  %p625_p0 = pneg %p624_p11  ;;  %p630_p13 = scmp.lt.s32.totalorder %s628_s4, %s622_s28 }
  0x43   : > { %508 = vmatprep.subr.bf16.mxu0 %v507_v13  ;;  %517 = vmatprep.subr.bf16.mxu1 %v507_v13 }
  0x44   : > { %p631_p2 = por %p630_p13, %p629_p6 }
  0x45   : > { %239 = vperm.xlu1 %591, %v221_v16   ;;  %229 = vperm.xlu0 %590, %v219_v17  }
  0x46   : > { %510 = vmatpush3.bf16.msra.mxu0 %v507_v13  ;;  %521 = vmatpush3.bf16.msra.mxu1 %v507_v13  ;;  %p632_p5 = pnand %p631_p2, %p625_p0 }
  0x47   : > { %512 = vmatprep.subr.bf16.mxu0 %v511_v18  ;;  %518 = vmatprep.subr.bf16.mxu1 %v511_v18 }
  0x4a   : > { %514 = vmatpush3.bf16.msra.mxu0 %v511_v18  ;;  %522 = vmatpush3.bf16.msra.mxu1 %v511_v18 }
  0x4d   : > { %494 = vmatmul.mubr.msk.f32.vlgmr.msra.gmra.mrb[0].mxu0 %vm242_vm0, %v207_v19  ;;  %497 = vmatmul.mubr.msk.f32.vlgmr.msra.gmra.mrb[0].mxu1 %vm242_vm0, %v209_v20 }
  0xc0   : > { %v235_v21 = vpop.permute.xlu1 %234  ;;  %v225_v22 = vpop.permute.xlu0 %224 }
  0xc4   : > { %v240_v23 = vpop.permute.xlu1 %239  ;;  %v230_v24 = vpop.permute.xlu0 %229 }
 0x120   : > { %v495_v25 = vpop.f32.mrb[0].mxu0  ;;  %v498_v26 = vpop.f32.mrb[0].mxu1 }
 0x121   : > { %v327_v27 = vadd.f32 %v495_v25, %v230_v24  ;;  %v337_v28 = vadd.f32 %v498_v26, %v240_v23  ;;  %v321_v29 = vpop.f32.mrb[1].mxu0  ;;  %v331_v30 = vpop.f32.mrb[1].mxu1 }
 0x122   : > { %v322_v31 = vadd.f32 %v321_v29, %v225_v22  ;;  %v332_v32 = vadd.f32 %v331_v30, %v235_v21 }
 0x123   : > { %341 = vst [vmem:[%s205_s8 + $0x8] sm:$0xff] %v327_v27  ;;  %343 = vst [vmem:[%s205_s8 + $0x18] sm:$0xff] %v337_v28 }
 0x124   : > { %340 = vst [vmem:[%s205_s8] sm:$0xff] %v322_v31  ;;  %342 = vst [vmem:[%s205_s8 + $0x10] sm:$0xff] %v332_v32 }
 0x125   : > { %635 = shalt.err (!%p632_p5)
}
 0x126   : > { %s636_s5 = scalar_lea.hbm %s888_s23, 512  ;;  %s640_s19 = scalar_lea.hbm %s940_s3, 1024 }
 0x127   : > { %p637_p4 = scmp.ne.s32.totalorder %s888_s23, %s636_s5  ;;  %p641_p12 = scmp.lt.u32.totalorder %s888_s23, %s940_s3 }
 0x128   : > { %p642_p1 = scmp.lt.u32.totalorder %s640_s19, %s636_s5  ;;  %p644_p8 = scmp.lt.u32.totalorder %s636_s5, %s888_s23 }
 0x129   : > { %p638_p7 = pnand %p637_p4, %p948_p9 }
 0x12a   : > { %p643_p3 = por %p642_p1, %p641_p12 }
 0x12b   : > { %p639_p10 = pneg %p638_p7 }
 0x12c   : > { %p645_p11 = por %p644_p8, %p643_p3 }
 0x12e   : > { %p646_p0 = pnand %p645_p11, %p639_p10 }
 0x130   : > { %649 = shalt.err (!%p646_p0)
}
 0x131   : > { %s711_s8 = smov 128   ;;  %s712_s9 = smov 8  }
 0x132   : > { %525 = dma.vmem_to_hbm [thread:$0]  (%p948_p9), %s883_s24, 512, %s888_s23, %s345_s15, %s711_s8, %s711_s8, %s712_s9  }
 0x133 PF: > { %s374_s10 = sand.u32 1, %s684_s12   ;;  %p949_p6 = scmp.ne.s32.totalorder %s945_s27, 0 }
 0x134   : > { %p950_p13 = scmp.ge.s32.totalorder %s704_s17, 2  ;;  %s375_s22 = scalar_lea.sflag [#allocation4], %s374_s10 }
 0x136   : > { %p532_p2 = pnand %p950_p13, %p949_p6 }
 0x138   : > { %679 = dma.done.wait (!%p532_p2), %s375_s22, 512  }
 0x139   : > { %681 = vsyncadd (!%p532_p2), %s375_s22, 4294966784  ;;  %s19_s17 = sadd.s32 1, %s704_s17   ;;  %s951_s12 = smov %s688_s13 }
 0x13a   : > { %p16_p5 = scmp.ge.s32.totalorder %s19_s17, 4   ;;  %s952_s13 = smov %s692_s14 }
 0x13b   : > { %s953_s14 = smov %s789_s26  ;;  %s954_s15 = smov %s700_s16 }
 0x13c   : > { %s955_s16 = smov %s957_s20  ;;  %18 = sbr.rel (!%p16_p5) target bundleno = 6 (0x6), region = 77 }
 0x143   :  { %380 = vsyncpa [#allocation3], 1 }
 0x144   :  { %382 = vsyncpa [#allocation3 + $0x1], 1 }
 0x145   :  { %383 = vsyncpa [#allocation4], 1 }
 0x146   :  { %385 = vsyncpa [#allocation4 + $0x1], 1 }

</bundles_post_ra>
